<compile_context>
chip_gen: v6e
topology: v6e:2x2x1
jax: 0.10.0
libtpu: 0.0.40
codegen_flags: <defaults>
</compile_context>

<pallas_src>
from functools import partial

import jax
import jax.numpy as jnp
from jax.experimental import pallas as pl
from jax.experimental.pallas import tpu as pltpu

STATE_DIM = 47
ACTION_DIM = 10
HIDDEN = 128          # actor_net == actcri_net == 128
MAX_ACTION = 1.0

PAD_IN = 128          # state dim padded to a full lane width (row 47 = bias lane)
PAD_OUT = 128         # action dim padded to a full lane width
BIAS_COL = STATE_DIM  # input column holding the constant 1.0 for the b1 fold


def actor_kernel(x_ref, w_ref, b_ref, o_ref):
    # x_ref : (TB, 128)      bf16   padded states; column 47 == 1.0 (bias lane)
    # w_ref : (3, 128, 128)  bf16   [w1p (b1 folded into row 47), w2, w3p]  (resident)
    # b_ref : (2, 1, 128)    f32    [b2, b3p]                               (resident)
    # o_ref : (TB, 128)      bf16   padded actions
    x = x_ref[...]

    # Layer 1: Linear(47->128), b1 folded into the matmul via the bias lane.
    h1 = jnp.maximum(
        jnp.dot(x, w_ref[0], preferred_element_type=jnp.float32), 0.0)

    # Layer 2: Linear(128->128) + ReLU. MXU bf16 operands, f32 accumulation.
    h2 = jnp.maximum(
        jnp.dot(h1.astype(jnp.bfloat16), w_ref[1],
                preferred_element_type=jnp.float32) + b_ref[0], 0.0)

    # Layer 3: Linear(128->10 padded to 128), then tanh (EUP, f32).
    h3 = jnp.dot(h2.astype(jnp.bfloat16), w_ref[2],
                 preferred_element_type=jnp.float32) + b_ref[1]
    out = jnp.tanh(h3)
    if MAX_ACTION != 1.0:           # elide the dead multiply when max_action == 1
        out = MAX_ACTION * out
    o_ref[...] = out.astype(o_ref.dtype)


def pack_actor_params(params):
    """One-time packing: (w1,b1,w2,b2,w3,b3) f32 -> (W bf16 (3,128,128), B f32 (2,1,128)).
    Weights are [in, out]; biases [1, out]. b1 is folded into row 47 of w1p."""
    w1, b1, w2, b2, w3, b3 = params
    w1p = jnp.zeros((PAD_IN, HIDDEN), jnp.float32).at[:STATE_DIM, :].set(w1)
    w1p = w1p.at[BIAS_COL, :].set(b1.reshape(-1))          # bias fold
    w3p = jnp.zeros((HIDDEN, PAD_OUT), jnp.float32).at[:, :ACTION_DIM].set(w3)
    b3p = jnp.zeros((1, PAD_OUT), jnp.float32).at[:, :ACTION_DIM].set(b3)
    W = jnp.stack([w1p, w2, w3p]).astype(jnp.bfloat16)      # (3, 128, 128) bf16
    B = jnp.stack([b2, b3p])                                 # (2, 1, 128)  f32
    return W, B


@partial(jax.jit, static_argnames=("block_batch",))
def actor_forward(x, W, B, block_batch=512):
    """x: (batch, STATE_DIM) f32; W/B from pack_actor_params.
    Returns (batch, ACTION_DIM) f32."""
    batch = x.shape[0]

    # --- batch tile: multiple of 16 (bf16 sublane tile), >=2 grid steps when
    # --- possible so the "parallel" axis engages both TCs on v7x ------------
    min_padded = pl.cdiv(batch, 16) * 16
    tb = min(block_batch, min_padded)
    if min_padded >= 32:
        half = max(16, (min_padded // 2 // 16) * 16)
        tb = min(tb, half) if tb > half else tb
        tb = min(tb, max(16, half)) if min_padded // tb < 2 else tb
    padded_batch = pl.cdiv(min_padded, tb) * tb

    # --- pad/cast input; set the bias lane to 1.0 (fuses under jit) ---------
    xp = jnp.zeros((padded_batch, PAD_IN), jnp.bfloat16)
    xp = xp.at[:batch, :STATE_DIM].set(x.astype(jnp.bfloat16))
    xp = xp.at[:, BIAS_COL].set(jnp.bfloat16(1.0))

    out_pad = pl.pallas_call(
        actor_kernel,
        out_shape=jax.ShapeDtypeStruct((padded_batch, PAD_OUT), jnp.bfloat16),
        grid=(padded_batch // tb,),
        in_specs=[
            pl.BlockSpec((tb, PAD_IN), lambda i: (i, 0)),            # x tile
            pl.BlockSpec((3, HIDDEN, HIDDEN), lambda i: (0, 0, 0)),  # weights (resident)
            pl.BlockSpec((2, 1, PAD_OUT), lambda i: (0, 0, 0)),      # biases  (resident)
        ],
        out_specs=pl.BlockSpec((tb, PAD_OUT), lambda i: (i, 0)),
        compiler_params=pltpu.CompilerParams(
            dimension_semantics=("parallel",),          # megacore on v7x
            vmem_limit_bytes=32 * 1024 * 1024,          # safe for v7x's 64 MiB VMEM
        ),
    )(xp, W, B)

    return out_pad[:batch, :ACTION_DIM].astype(jnp.float32)


def init_linear(key, fan_in, fan_out):
    # Mimic PyTorch nn.Linear default init: U(-1/sqrt(fan_in), 1/sqrt(fan_in)).
    kw, kb = jax.random.split(key)
    bound = 1.0 / jnp.sqrt(jnp.float32(fan_in))
    w = jax.random.uniform(kw, (fan_in, fan_out), jnp.float32, -bound, bound)
    b = jax.random.uniform(kb, (1, fan_out), jnp.float32, -bound, bound)
    return w, b


def reference_kernel_math(x, params):
    # Same numerics as the kernel: bf16 matmul operands (b1 folded -> bf16
    # rounded), f32 accumulation / elementwise.
    w1, b1, w2, b2, w3, b3 = params
    b1b = b1.astype(jnp.bfloat16).astype(jnp.float32)
    h1 = jnp.maximum(
        jnp.dot(x.astype(jnp.bfloat16), w1.astype(jnp.bfloat16),
                preferred_element_type=jnp.float32) + b1b, 0.0)
    h2 = jnp.maximum(
        jnp.dot(h1.astype(jnp.bfloat16), w2.astype(jnp.bfloat16),
                preferred_element_type=jnp.float32) + b2, 0.0)
    h3 = jnp.dot(h2.astype(jnp.bfloat16), w3.astype(jnp.bfloat16),
                 preferred_element_type=jnp.float32) + b3
    return MAX_ACTION * jnp.tanh(h3)


def reference_f32(x, params):
    w1, b1, w2, b2, w3, b3 = params
    h1 = jnp.maximum(x @ w1 + b1, 0.0)
    h2 = jnp.maximum(h1 @ w2 + b2, 0.0)
    return MAX_ACTION * jnp.tanh(h2 @ w3 + b3)


if __name__ == "__main__":
    key = jax.random.PRNGKey(0)
    k_x, k1, k2, k3 = jax.random.split(key, 4)

    w1, b1 = init_linear(k1, STATE_DIM, HIDDEN)
    w2, b2 = init_linear(k2, HIDDEN, HIDDEN)
    w3, b3 = init_linear(k3, HIDDEN, ACTION_DIM)
    params = (w1, b1, w2, b2, w3, b3)
    W, B = pack_actor_params(params)          # packed ONCE, reused per call

    for batch in (8, 40):                      # 40 exercises a multi-step grid
        x = jax.random.normal(k_x, (batch, STATE_DIM), jnp.float32)
        out = jax.block_until_ready(actor_forward(x, W, B))
        assert out.shape == (batch, ACTION_DIM)

        # Tight check against a plain-JAX reference with identical bf16 math
        # (output is bf16-quantized -> ~4e-3 absolute resolution near |1|).
        ref_b = reference_kernel_math(x, params)
        assert jnp.allclose(out, ref_b, atol=8e-3, rtol=8e-3)

        # Loose check against the pure-f32 PyTorch-equivalent math.
        ref_f = reference_f32(x, params)
        assert jnp.allclose(out, ref_f, atol=3e-2, rtol=3e-2)

    print("KERNEL_OK")
</pallas_src>

<mosaic_0001>
module attributes {stable_mosaic.version = 11 : i64} {
  func.func @actor_kernel(%arg0: i32, %arg1: memref<16x128xbf16, #tpu.memory_space<vmem>>, %arg2: memref<3x128x128xbf16, #tpu.memory_space<vmem>>, %arg3: memref<2x1x128xf32, #tpu.memory_space<vmem>>, %arg4: memref<16x128xbf16, #tpu.memory_space<vmem>>) attributes {dimension_semantics = [#tpu.dimension_semantics<parallel>], iteration_bounds = array<i64: 1>, scalar_prefetch = 0 : i64, scratch_operands = 0 : i64, tpu.core_type = #tpu.core_type<tc>, window_params = [{transform_indices = @transform_0, window_bounds = array<i64: 16, 128>}, {pipeline_mode = #tpu.pipeline_mode<synchronous>, transform_indices = @transform_1, window_bounds = array<i64: 3, 128, 128>}, {pipeline_mode = #tpu.pipeline_mode<synchronous>, transform_indices = @transform_2, window_bounds = array<i64: 2, 1, 128>}, {transform_indices = @transform_3, window_bounds = array<i64: 16, 128>}]} {
    %c0 = arith.constant 0 : index
    %c0_0 = arith.constant 0 : index
    %0 = vector.load %arg1[%c0, %c0_0] : memref<16x128xbf16, #tpu.memory_space<vmem>>, vector<16x128xbf16>
    %c0_1 = arith.constant 0 : index
    %c0_2 = arith.constant 0 : index
    %c0_3 = arith.constant 0 : index
    %1 = vector.load %arg2[%c0_1, %c0_2, %c0_3] : memref<3x128x128xbf16, #tpu.memory_space<vmem>>, vector<1x128x128xbf16>
    %2 = vector.shape_cast %1 : vector<1x128x128xbf16> to vector<128x128xbf16>
    %cst = arith.constant dense<0.000000e+00> : vector<16x128xf32>
    %3 = tpu.matmul %0, %2, %cst {dimension_numbers = #tpu.dot_dimension_numbers<[1], [0], [0], [1], [0, 0, 1, 1], [], []>} : vector<16x128xbf16>, vector<128x128xbf16>, vector<16x128xf32> -> vector<16x128xf32>
    %cst_4 = arith.constant 0.000000e+00 : f32
    %4 = vector.broadcast %cst_4 : f32 to vector<16x128xf32>
    %5 = arith.maximumf %3, %4 : vector<16x128xf32>
    %6 = arith.truncf %5 : vector<16x128xf32> to vector<16x128xbf16>
    %c1 = arith.constant 1 : index
    %c0_5 = arith.constant 0 : index
    %c0_6 = arith.constant 0 : index
    %7 = vector.load %arg2[%c1, %c0_5, %c0_6] : memref<3x128x128xbf16, #tpu.memory_space<vmem>>, vector<1x128x128xbf16>
    %8 = vector.shape_cast %7 : vector<1x128x128xbf16> to vector<128x128xbf16>
    %cst_7 = arith.constant dense<0.000000e+00> : vector<16x128xf32>
    %9 = tpu.matmul %6, %8, %cst_7 {dimension_numbers = #tpu.dot_dimension_numbers<[1], [0], [0], [1], [0, 0, 1, 1], [], []>} : vector<16x128xbf16>, vector<128x128xbf16>, vector<16x128xf32> -> vector<16x128xf32>
    %c0_8 = arith.constant 0 : index
    %c0_9 = arith.constant 0 : index
    %c0_10 = arith.constant 0 : index
    %10 = vector.load %arg3[%c0_8, %c0_9, %c0_10] : memref<2x1x128xf32, #tpu.memory_space<vmem>>, vector<1x1x128xf32>
    %11 = vector.shape_cast %10 : vector<1x1x128xf32> to vector<1x128xf32>
    %12 = vector.broadcast %11 : vector<1x128xf32> to vector<16x128xf32>
    %13 = arith.addf %9, %12 : vector<16x128xf32>
    %cst_11 = arith.constant 0.000000e+00 : f32
    %14 = vector.broadcast %cst_11 : f32 to vector<16x128xf32>
    %15 = arith.maximumf %13, %14 : vector<16x128xf32>
    %16 = arith.truncf %15 : vector<16x128xf32> to vector<16x128xbf16>
    %c2 = arith.constant 2 : index
    %c0_12 = arith.constant 0 : index
    %c0_13 = arith.constant 0 : index
    %17 = vector.load %arg2[%c2, %c0_12, %c0_13] : memref<3x128x128xbf16, #tpu.memory_space<vmem>>, vector<1x128x128xbf16>
    %18 = vector.shape_cast %17 : vector<1x128x128xbf16> to vector<128x128xbf16>
    %cst_14 = arith.constant dense<0.000000e+00> : vector<16x128xf32>
    %19 = tpu.matmul %16, %18, %cst_14 {dimension_numbers = #tpu.dot_dimension_numbers<[1], [0], [0], [1], [0, 0, 1, 1], [], []>} : vector<16x128xbf16>, vector<128x128xbf16>, vector<16x128xf32> -> vector<16x128xf32>
    %c1_15 = arith.constant 1 : index
    %c0_16 = arith.constant 0 : index
    %c0_17 = arith.constant 0 : index
    %20 = vector.load %arg3[%c1_15, %c0_16, %c0_17] : memref<2x1x128xf32, #tpu.memory_space<vmem>>, vector<1x1x128xf32>
    %21 = vector.shape_cast %20 : vector<1x1x128xf32> to vector<1x128xf32>
    %22 = vector.broadcast %21 : vector<1x128xf32> to vector<16x128xf32>
    %23 = arith.addf %19, %22 : vector<16x128xf32>
    %24 = math.tanh %23 : vector<16x128xf32>
    %25 = arith.truncf %24 : vector<16x128xf32> to vector<16x128xbf16>
    %c0_18 = arith.constant 0 : index
    %c0_19 = arith.constant 0 : index
    %26 = vector.load %arg4[%c0_18, %c0_19] : memref<16x128xbf16, #tpu.memory_space<vmem>>, vector<16x128xbf16>
    tpu.vector_store %arg4[%c0_18, %c0_19], %25 {strides = array<i32>} : memref<16x128xbf16, #tpu.memory_space<vmem>>, vector<16x128xbf16>,
    return
  }
  func.func @transform_0(%arg0: i32) -> (i32, i32) {
    %c0_i32 = arith.constant 0 : i32
    %c0_i32_0 = arith.constant 0 : i32
    return %arg0, %c0_i32 : i32, i32
  }
  func.func @transform_1(%arg0: i32) -> (i32, i32, i32) {
    %c0_i32 = arith.constant 0 : i32
    %c0_i32_0 = arith.constant 0 : i32
    %c0_i32_1 = arith.constant 0 : i32
    %c0_i32_2 = arith.constant 0 : i32
    return %c0_i32, %c0_i32_0, %c0_i32_1 : i32, i32, i32
  }
  func.func @transform_2(%arg0: i32) -> (i32, i32, i32) {
    %c0_i32 = arith.constant 0 : i32
    %c0_i32_0 = arith.constant 0 : i32
    %c0_i32_1 = arith.constant 0 : i32
    %c0_i32_2 = arith.constant 0 : i32
    return %c0_i32, %c0_i32_0, %c0_i32_1 : i32, i32, i32
  }
  func.func @transform_3(%arg0: i32) -> (i32, i32) {
    %c0_i32 = arith.constant 0 : i32
    %c0_i32_0 = arith.constant 0 : i32
    return %arg0, %c0_i32 : i32, i32
  }
}

</mosaic_0001>

<bundles_post_ra>
// kernel: actor_forward.1
= control target key start
LH: loop header
LB: loop body
LE: loop exit
PB: predicated region body
PF: predicated region fallthrough
CT: control target
= control target key end

     0   :  { %8 = vsyncpa [#allocation3], 0  ;;  %s572_s12 = smov [#allocation2]   ;;  %s642_s0 = inlined_call_operand.vmem [shape: bf16[16,128], index: 0, kind: input, shape index: {}]   ;;  %s643_s1 = inlined_call_operand.hbm [shape: bf16[3,128,128], index: 1, kind: input, shape index: {}]   ;;  %s644_s2 = inlined_call_operand.vmem [shape: f32[2,1,128], index: 2, kind: input, shape index: {}]   ;;  %s645_s3 = inlined_call_operand.vmem [shape: bf16[16,128], index: 3, kind: output, shape index: {}]  }
   0x1   :  { %s16_s13 = sshll.u32 %s572_s12, 4  ;;  %s17_s13 = int_to_ptr.vmem [resolvable:$true] %s16_s13 }
   0x2   :  { %s558_s14 = scalar_lea.vmem %s17_s13, 3072  ;;  %p563_p1 = scmp.lt.s32.totalorder %s17_s13, %s17_s13 }
   0x3   :  { %p559_p0 = scmp.ne.s32.totalorder %s17_s13, %s558_s14  ;;  %p564_p2 = scmp.lt.s32.totalorder %s558_s14, %s558_s14 }
   0x5   :  { %p565_p3 = por %p564_p2, %p563_p1 }
   0x7   :  { %p566_p4 = pnand %p565_p3, %p559_p0 }
   0x9   :  { %569 = shalt.err (!%p566_p4)
}
   0xa   :  { %s573_s15 = smov 64   ;;  %s574_s16 = smov 4  }
   0xb   :  { %22 = dma.hbm_to_vmem [thread:$0]  %s643_s1, 3072, %s17_s13, [#allocation3], %s573_s15, %s573_s15, %s574_s16  }
   0xc   :  { %570 = dma.done.wait [#allocation3], 3072  }
   0xd   :  { %571 = vsyncadd [#allocation3], 4294964224  ;;  %v575_v0 = vmov 0.0   ;;  %vm576_vm0 = vmmov 0   ;;  %v521_v1 = vld [vmem:[#allocation2 + $0x38] sm:$0xff]   ;;  %v522_v2 = vld [vmem:[#allocation2 + $0x30] sm:$0xff]  }
   0xe   :  { %456 = vmatprep.subr.bf16.mxu0 %v575_v0  ;;  %472 = vmatprep.mubr.msk.bf16.mxu0 %vm576_vm0, %v575_v0  ;;  %v523_v3 = vld [vmem:[#allocation2 + $0x28] sm:$0xff]   ;;  %v530_v4 = vld [vmem:[#allocation2 + $0x78] sm:$0xff]   ;;  %v524_v5 = vld [vmem:[#allocation2 + $0x20] sm:$0xff]  }
   0xf   :  { %476 = vmatprep.subr.bf16.mxu1 %v575_v0  ;;  %492 = vmatprep.mubr.msk.bf16.mxu1 %vm576_vm0, %v575_v0  ;;  %v531_v6 = vld [vmem:[#allocation2 + $0x70] sm:$0xff]   ;;  %v525_v7 = vld [vmem:[#allocation2 + $0x18] sm:$0xff]   ;;  %v532_v8 = vld [vmem:[#allocation2 + $0x68] sm:$0xff]  }
  0x10   :  { %457 = vmatpush3.bf16.msra.mxu0 %v521_v1  ;;  %477 = vmatpush3.bf16.msra.mxu1 %v530_v4  ;;  %v526_v9 = vld [vmem:[#allocation2 + $0x10] sm:$0xff]   ;;  %v533_v10 = vld [vmem:[#allocation2 + $0x60] sm:$0xff]   ;;  %v527_v11 = vld [vmem:[#allocation2 + $0x8] sm:$0xff]  }
  0x11   :  { %458 = vmatprep.subr.bf16.mxu0 %v575_v0  ;;  %478 = vmatprep.subr.bf16.mxu1 %v575_v0  ;;  %v534_v12 = vld [vmem:[#allocation2 + $0x58] sm:$0xff]   ;;  %v528_v13 = vld [vmem:[#allocation2] sm:$0xff]   ;;  %v535_v14 = vld [vmem:[#allocation2 + $0x50] sm:$0xff]  }
  0x12   :  { %v529_v15 = vld [vmem:[%s642_s0] sm:$0xff]   ;;  %v536_v16 = vld [vmem:[#allocation2 + $0x48] sm:$0xff]   ;;  %v538_v18 = vld [vmem:[#allocation2 + $0xb8] sm:$0xff]  }
  0x13   :  { %v537_v17 = vld [vmem:[#allocation2 + $0x40] sm:$0xff]   ;;  %v539_v19 = vld [vmem:[#allocation2 + $0xb0] sm:$0xff]   ;;  %v540_v20 = vld [vmem:[#allocation2 + $0xa8] sm:$0xff]  }
  0x14   :  { %459 = vmatpush3.bf16.msra.mxu0 %v522_v2  ;;  %479 = vmatpush3.bf16.msra.mxu1 %v531_v6  ;;  %v541_v21 = vld [vmem:[#allocation2 + $0xa0] sm:$0xff]   ;;  %v542_v22 = vld [vmem:[#allocation2 + $0x98] sm:$0xff]   ;;  %v543_v30 = vld [vmem:[#allocation2 + $0x90] sm:$0xff]  }
  0x15   :  { %460 = vmatprep.subr.bf16.mxu0 %v575_v0  ;;  %480 = vmatprep.subr.bf16.mxu1 %v575_v0  ;;  %v544_v31 = vld [vmem:[#allocation2 + $0x88] sm:$0xff]   ;;  %v545_v32 = vld [vmem:[#allocation2 + $0x80] sm:$0xff]  }
  0x16   :  { %v401_v33 = vld [vmem:[%s644_s2] ss:$0 sm:$0xff]  ;;  %v411_v43 = vld [vmem:[%s644_s2 + $0x1] ss:$0 sm:$0xff] }
  0x18   :  { %461 = vmatpush3.bf16.msra.mxu0 %v523_v3  ;;  %481 = vmatpush3.bf16.msra.mxu1 %v532_v8 }
  0x19   :  { %462 = vmatprep.subr.bf16.mxu0 %v575_v0  ;;  %482 = vmatprep.subr.bf16.mxu1 %v575_v0 }
  0x1c   :  { %463 = vmatpush3.bf16.msra.mxu0 %v524_v5  ;;  %483 = vmatpush3.bf16.msra.mxu1 %v533_v10 }
  0x1d   :  { %464 = vmatprep.subr.bf16.mxu0 %v575_v0  ;;  %484 = vmatprep.subr.bf16.mxu1 %v575_v0 }
  0x20   :  { %465 = vmatpush3.bf16.msra.mxu0 %v525_v7  ;;  %485 = vmatpush3.bf16.msra.mxu1 %v534_v12 }
  0x21   :  { %466 = vmatprep.subr.bf16.mxu0 %v575_v0  ;;  %486 = vmatprep.subr.bf16.mxu1 %v575_v0 }
  0x24   :  { %467 = vmatpush3.bf16.msra.mxu0 %v526_v9  ;;  %487 = vmatpush3.bf16.msra.mxu1 %v535_v14 }
  0x25   :  { %468 = vmatprep.subr.bf16.mxu0 %v575_v0  ;;  %488 = vmatprep.subr.bf16.mxu1 %v575_v0 }
  0x28   :  { %469 = vmatpush3.bf16.msra.mxu0 %v527_v11  ;;  %489 = vmatpush3.bf16.msra.mxu1 %v536_v16 }
  0x29   :  { %470 = vmatprep.subr.bf16.mxu0 %v575_v0  ;;  %490 = vmatprep.subr.bf16.mxu1 %v575_v0 }
  0x2c   :  { %471 = vmatpush3.bf16.msra.mxu0 %v528_v13  ;;  %491 = vmatpush3.bf16.msra.mxu1 %v537_v17 }
  0x2d   :  { %496 = vmatprep.subr.bf16.mxu0 %v575_v0 }
  0x2f   :  { %473 = vmatmul.mubr.bf16.vlgmr.msra.gmra.mxu0 %v529_v15 }
  0x30   :  { %512 = vmatprep.mubr.msk.bf16.mxu0 %vm576_vm0, %v575_v0  ;;  %497 = vmatpush3.bf16.msra.mxu0 %v538_v18 }
  0x31   :  { %498 = vmatprep.subr.bf16.mxu0 %v575_v0 }
  0x34   :  { %499 = vmatpush3.bf16.msra.mxu0 %v539_v19 }
  0x35   :  { %500 = vmatprep.subr.bf16.mxu0 %v575_v0 }
  0x38   :  { %501 = vmatpush3.bf16.msra.mxu0 %v540_v20 }
  0x39   :  { %502 = vmatprep.subr.bf16.mxu0 %v575_v0 }
  0x3c   :  { %503 = vmatpush3.bf16.msra.mxu0 %v541_v21 }
  0x3d   :  { %504 = vmatprep.subr.bf16.mxu0 %v575_v0 }
  0x40   :  { %505 = vmatpush3.bf16.msra.mxu0 %v542_v22 }
  0x41   :  { %506 = vmatprep.subr.bf16.mxu0 %v575_v0 }
  0x44   :  { %507 = vmatpush3.bf16.msra.mxu0 %v543_v30 }
  0x45   :  { %508 = vmatprep.subr.bf16.mxu0 %v575_v0 }
  0x48   :  { %509 = vmatpush3.bf16.msra.mxu0 %v544_v31 }
  0x49   :  { %510 = vmatprep.subr.bf16.mxu0 %v575_v0 }
  0x4c   :  { %511 = vmatpush3.bf16.msra.mxu0 %v545_v32 }
  0xef   :  { %v135_v23 = vpop.f32.mrf.mxu0 }
  0xf0   :  { %v142_v26 = vmax.f32 %v135_v23, 0.0 }
  0xf1   :  { %v474_v24 = vpop.f32.mrf.mxu0 }
  0xf3   :  { %v138_v25 = vpop.f32.mrf.mxu0 }
  0xf4   :  { %v143_v27 = vmax.f32 %v138_v25, 0.0 }
  0xf5   :  { %v475_v28 = vpop.f32.mrf.mxu0 }
  0xf6   :  { %v144_v29 = vpack.c.bf16 %v143_v27, %v142_v26 }
  0xf8   :  { %493 = vmatmul.mubr.bf16.vlgmr.msra.gmra.mxu1 %v144_v29 }
 0x1b8   :  { %v251_v34 = vpop.f32.mrf.mxu1 }
 0x1b9   :  { %v252_v36 = vadd.f32 %v401_v33, %v251_v34 }
 0x1ba   :  { %v494_v35 = vpop.f32.mrf.mxu1 }
 0x1bb   :  { %v258_v40 = vmax.f32 %v252_v36, 0.0 }
 0x1bc   :  { %v254_v37 = vpop.f32.mrf.mxu1 }
 0x1bd   :  { %v255_v38 = vadd.f32 %v401_v33, %v254_v37 }
 0x1be   :  { %v495_v39 = vpop.f32.mrf.mxu1 }
 0x1bf   :  { %v259_v41 = vmax.f32 %v255_v38, 0.0 }
 0x1c1   :  { %v260_v42 = vpack.c.bf16 %v259_v41, %v258_v40 }
 0x1c3   :  { %513 = vmatmul.mubr.bf16.vlgmr.msra.gmra.mxu0 %v260_v42 }
 0x283   :  { %v368_v44 = vpop.f32.mrf.mxu0 }
 0x284   :  { %v369_v45 = vadd.f32 %v411_v43, %v368_v44 }
 0x285   :  { %v514_v46 = vpop.f32.mrf.mxu0 }
 0x286   :  { %546 = vtanh.f32 %v369_v45 }
 0x287   :  { %v371_v47 = vpop.f32.mrf.mxu0 }
 0x288   :  { %v372_v48 = vadd.f32 %v411_v43, %v371_v47 }
 0x289   :  { %v515_v49 = vpop.f32.mrf.mxu0 }
 0x28a   :  { %548 = vtanh.f32 %v372_v48 }
 0x293   :  { %v547_v50 = vpop.eup %546 }
 0x297   :  { %v549_v51 = vpop.eup %548 }
 0x298   :  { %v427_v52 = vpack.c.bf16 %v549_v51, %v547_v50 }
 0x29a   :  { %428 = vst [vmem:[%s645_s3] sm:$0xff] %v427_v52  }
 0x29b   :  { %391 = vsyncpa [#allocation3], 1 }

</bundles_post_ra>
